<compile_context>
chip_gen: v5e
topology: v5e:2x2
jax: 0.10.0
libtpu: 0.0.40
codegen_flags: <defaults>
</compile_context>

<pallas_src>
import functools

import jax
import jax.numpy as jnp
from jax import lax
from jax.experimental import pallas as pl
from jax.experimental.pallas import tpu as pltpu

EPS = 1e-5


def _bn_relu(h, gamma, beta):
    """Training-mode BatchNorm1d (biased batch variance) + affine + ReLU, one-pass stats."""
    inv_n = 1.0 / h.shape[0]
    mean = jnp.sum(h, axis=0, keepdims=True) * inv_n          # XLU reduce
    mean_sq = jnp.sum(h * h, axis=0, keepdims=True) * inv_n   # XLU reduce
    var = jnp.maximum(mean_sq - mean * mean, 0.0)             # clamp: cancellation guard
    scale = gamma * lax.rsqrt(var + EPS)                      # rsqrt -> EUP slot
    shift = beta - mean * scale
    return jnp.maximum(h * scale + shift, 0.0)                # fused FMA + max on VPU


def dense_net_kernel(x_ref, w1_ref, w2_ref, w3_ref, w4_ref, vec_ref, o_ref, *, lin, n_pad):
    # vec_ref rows: 0=g1, 1=be1, 2=g2, 3=be2, 4=g3, 5=be3, 6=b4 (padded), 7=zero pad.
    # Weights arrive as bf16; dots run the native bf16 MXU path with f32 accumulation.
    x = x_ref[...]

    h = jnp.dot(x.astype(jnp.bfloat16), w1_ref[...],
                preferred_element_type=jnp.float32)
    h = _bn_relu(h, vec_ref[0:1, :lin], vec_ref[1:2, :lin])

    h = jnp.dot(h.astype(jnp.bfloat16), w2_ref[...],
                preferred_element_type=jnp.float32)
    h = _bn_relu(h, vec_ref[2:3, :lin], vec_ref[3:4, :lin])

    h = jnp.dot(h.astype(jnp.bfloat16), w3_ref[...],
                preferred_element_type=jnp.float32)
    h = _bn_relu(h, vec_ref[4:5, :lin], vec_ref[5:6, :lin])

    out = jnp.dot(h.astype(jnp.bfloat16), w4_ref[...],
                  preferred_element_type=jnp.float32) + vec_ref[6:7, :n_pad]
    o_ref[...] = out.astype(o_ref.dtype)


def prepare_kernel_params(params, output_size):
    """One-time (init-time) prep: bf16 weight casts, lane-dense padding of the final
    layer, and packing of the 7 tiny vectors into one (8, slab) f32 slab.
    Do NOT call this inside the per-step jit — hoisting it is the point."""
    (w1, b1, g1, be1, w2, b2, g2, be2, w3, b3, g3, be3, w4, b4) = params
    del b1, b2, b3  # exactly cancelled by training-mode BN mean subtraction

    lin = w1.shape[1]
    assert w2.shape[1] == lin and w3.shape[1] == lin and w4.shape[0] == lin, \
        "uniform hidden width assumed"
    assert lin % 128 == 0, "hidden width must be lane-aligned"

    n_pad = 128 * ((output_size + 127) // 128)   # lane-dense, decoupled from lin
    slab = max(lin, n_pad)

    w4p = jnp.zeros((lin, n_pad), jnp.float32).at[:, :output_size].set(w4)

    vecs = jnp.zeros((8, slab), jnp.float32)
    vecs = (vecs.at[0, :lin].set(g1.reshape(-1)).at[1, :lin].set(be1.reshape(-1))
                 .at[2, :lin].set(g2.reshape(-1)).at[3, :lin].set(be2.reshape(-1))
                 .at[4, :lin].set(g3.reshape(-1)).at[5, :lin].set(be3.reshape(-1))
                 .at[6, :output_size].set(b4.reshape(-1)))

    kparams = (w1.astype(jnp.bfloat16), w2.astype(jnp.bfloat16),
               w3.astype(jnp.bfloat16), w4p.astype(jnp.bfloat16), vecs)
    meta = dict(lin=int(lin), n_pad=int(n_pad), output_size=int(output_size))
    return kparams, meta


@functools.partial(jax.jit, static_argnames=("lin", "n_pad", "output_size"))
def simple_dense_net_forward(x, w1b, w2b, w3b, w4b, vecs, *, lin, n_pad, output_size):
    """x: (B, C, W, H) float32. Weight args come pre-quantized/packed from
    prepare_kernel_params; nothing but reshape + the pallas_call runs per step."""
    B = x.shape[0]
    x_flat = x.reshape(B, -1)  # row-major, identical to torch .view(B, -1)
    in_features = x_flat.shape[1]

    flops = 2 * B * (in_features * lin + lin * lin + lin * lin + lin * n_pad)
    bytes_accessed = (x_flat.size * 4
                      + (w1b.size + w2b.size + w3b.size + w4b.size) * 2
                      + vecs.size * 4
                      + B * n_pad * 4)
    cost = pl.CostEstimate(flops=flops, transcendentals=3 * lin,
                           bytes_accessed=bytes_accessed)

    vmem_spec = pl.BlockSpec(memory_space=pltpu.MemorySpace.VMEM)
    kernel = functools.partial(dense_net_kernel, lin=lin, n_pad=n_pad)
    out_padded = pl.pallas_call(
        kernel,
        out_shape=jax.ShapeDtypeStruct((B, n_pad), jnp.float32),
        in_specs=[vmem_spec] * 6,
        out_specs=vmem_spec,
        cost_estimate=cost,
    )(x_flat, w1b, w2b, w3b, w4b, vecs)

    # TODO(synk): for large B, add a "parallel" batch grid with two-pass BN stats
    # (cross-core reduce) so v7x's second TensorCore is used; gridless is optimal here.
    # TODO(synk): if input_size/lin grow toward v7x's 64 MiB VMEM, switch w1 to a
    # K-tiled BlockSpec grid with an f32 accumulator scratch and set vmem_limit_bytes.
    return out_padded[:, :output_size]


def init_params(key, input_size, lin1, lin2, lin3, output_size):
    """Deterministic init mimicking PyTorch defaults (Linear: U(-1/sqrt(fan_in), +);
    BatchNorm1d: gamma=1, beta=0). Layout matches the nn.Sequential order."""
    dims = [(input_size, lin1), (lin1, lin2), (lin2, lin3), (lin3, output_size)]
    params = []
    for i, (fan_in, fan_out) in enumerate(dims):
        key, kw, kb = jax.random.split(key, 3)
        bound = 1.0 / (fan_in ** 0.5)
        w = jax.random.uniform(kw, (fan_in, fan_out), jnp.float32, -bound, bound)
        b = jax.random.uniform(kb, (1, fan_out), jnp.float32, -bound, bound)
        params.extend([w, b])
        if i < 3:  # BN after the first three linear layers
            gamma = jnp.ones((1, fan_out), jnp.float32)
            beta = jnp.zeros((1, fan_out), jnp.float32)
            params.extend([gamma, beta])
    return tuple(params)


def reference_forward(x, params):
    """Pure-JAX reference of the module's math (biases included, two-pass BN),
    using the same bf16 dot operands as the kernel so the check isolates kernel
    correctness from bf16 quantization error vs the f32 PyTorch module."""
    B = x.shape[0]
    h = x.reshape(B, -1)
    (w1, b1, g1, be1, w2, b2, g2, be2, w3, b3, g3, be3, w4, b4) = params
    bf = lambda a: a.astype(jnp.bfloat16)
    for w, b, g, be in ((w1, b1, g1, be1), (w2, b2, g2, be2), (w3, b3, g3, be3)):
        h = jnp.dot(bf(h), bf(w), preferred_element_type=jnp.float32) + b
        m = h.mean(0, keepdims=True)
        v = ((h - m) ** 2).mean(0, keepdims=True)
        h = jnp.maximum((h - m) / jnp.sqrt(v + EPS) * g + be, 0.0)
    return jnp.dot(bf(h), bf(w4), preferred_element_type=jnp.float32) + b4


if __name__ == "__main__":
    # Small shapes consistent with the module's flatten-then-MLP forward.
    B, C, W, H = 8, 4, 16, 16
    input_size = C * W * H          # 1024
    lin1 = lin2 = lin3 = 128
    output_size = 10

    key = jax.random.PRNGKey(0)
    key, kx = jax.random.split(key)
    x = jax.random.normal(kx, (B, C, W, H), jnp.float32)
    params = init_params(key, input_size, lin1, lin2, lin3, output_size)

    # One-time prep, off the per-step hot path.
    kparams, meta = prepare_kernel_params(params, output_size)
    kparams = tuple(jax.block_until_ready(p) for p in kparams)

    out = simple_dense_net_forward(x, *kparams, **meta)
    out = jax.block_until_ready(out)

    ref = reference_forward(x, params)
    assert out.shape == (B, output_size)
    assert jnp.allclose(out, ref, atol=5e-3, rtol=5e-3), "mismatch vs reference"

    print("KERNEL_OK")
</pallas_src>

<mosaic_0001>
module attributes {stable_mosaic.version = 11 : i64} {
  func.func @dense_net_kernel(%arg0: memref<8x1024xf32, #tpu.memory_space<vmem>>, %arg1: memref<1024x128xbf16, #tpu.memory_space<vmem>>, %arg2: memref<128x128xbf16, #tpu.memory_space<vmem>>, %arg3: memref<128x128xbf16, #tpu.memory_space<vmem>>, %arg4: memref<128x128xbf16, #tpu.memory_space<vmem>>, %arg5: memref<8x128xf32, #tpu.memory_space<vmem>>, %arg6: memref<8x128xf32, #tpu.memory_space<vmem>>) attributes {dimension_semantics = [], scalar_prefetch = 0 : i64, scratch_operands = 0 : i64, tpu.core_type = #tpu.core_type<tc>} {
    %c0 = arith.constant 0 : index
    %c0_0 = arith.constant 0 : index
    %0 = vector.load %arg0[%c0, %c0_0] : memref<8x1024xf32, #tpu.memory_space<vmem>>, vector<8x1024xf32>
    %1 = arith.truncf %0 : vector<8x1024xf32> to vector<8x1024xbf16>
    %c0_1 = arith.constant 0 : index
    %c0_2 = arith.constant 0 : index
    %2 = vector.load %arg1[%c0_1, %c0_2] : memref<1024x128xbf16, #tpu.memory_space<vmem>>, vector<1024x128xbf16>
    %cst = arith.constant dense<0.000000e+00> : vector<8x128xf32>
    %3 = tpu.matmul %1, %2, %cst {dimension_numbers = #tpu.dot_dimension_numbers<[1], [0], [0], [1], [0, 0, 1, 1], [], []>} : vector<8x1024xbf16>, vector<1024x128xbf16>, vector<8x128xf32> -> vector<8x128xf32>
    %c0_3 = arith.constant 0 : index
    %c0_4 = arith.constant 0 : index
    %4 = vector.load %arg5[%c0_3, %c0_4] : memref<8x128xf32, #tpu.memory_space<vmem>>, vector<1x128xf32>
    %c1 = arith.constant 1 : index
    %c0_5 = arith.constant 0 : index
    %5 = vector.load %arg5[%c1, %c0_5] : memref<8x128xf32, #tpu.memory_space<vmem>>, vector<1x128xf32>
    %cst_6 = arith.constant dense<0.000000e+00> : vector<128xf32>
    %6 = vector.multi_reduction <add>, %3, %cst_6 [0] : vector<8x128xf32> to vector<128xf32>
    %7 = vector.shape_cast %6 : vector<128xf32> to vector<1x128xf32>
    %cst_7 = arith.constant 1.250000e-01 : f32
    %8 = vector.broadcast %cst_7 : f32 to vector<1x128xf32>
    %9 = arith.mulf %7, %8 : vector<1x128xf32>
    %10 = arith.mulf %3, %3 : vector<8x128xf32>
    %cst_8 = arith.constant dense<0.000000e+00> : vector<128xf32>
    %11 = vector.multi_reduction <add>, %10, %cst_8 [0] : vector<8x128xf32> to vector<128xf32>
    %12 = vector.shape_cast %11 : vector<128xf32> to vector<1x128xf32>
    %cst_9 = arith.constant 1.250000e-01 : f32
    %13 = vector.broadcast %cst_9 : f32 to vector<1x128xf32>
    %14 = arith.mulf %12, %13 : vector<1x128xf32>
    %15 = arith.mulf %9, %9 : vector<1x128xf32>
    %16 = arith.subf %14, %15 : vector<1x128xf32>
    %cst_10 = arith.constant 0.000000e+00 : f32
    %17 = vector.broadcast %cst_10 : f32 to vector<1x128xf32>
    %18 = arith.maximumf %16, %17 : vector<1x128xf32>
    %cst_11 = arith.constant 9.99999974E-6 : f32
    %19 = vector.broadcast %cst_11 : f32 to vector<1x128xf32>
    %20 = arith.addf %18, %19 : vector<1x128xf32>
    %21 = math.rsqrt %20 : vector<1x128xf32>
    %22 = arith.mulf %4, %21 : vector<1x128xf32>
    %23 = arith.mulf %9, %22 : vector<1x128xf32>
    %24 = arith.subf %5, %23 : vector<1x128xf32>
    %25 = vector.broadcast %22 : vector<1x128xf32> to vector<8x128xf32>
    %26 = arith.mulf %3, %25 : vector<8x128xf32>
    %27 = vector.broadcast %24 : vector<1x128xf32> to vector<8x128xf32>
    %28 = arith.addf %26, %27 : vector<8x128xf32>
    %cst_12 = arith.constant 0.000000e+00 : f32
    %29 = vector.broadcast %cst_12 : f32 to vector<8x128xf32>
    %30 = arith.maximumf %28, %29 : vector<8x128xf32>
    %31 = arith.truncf %30 : vector<8x128xf32> to vector<8x128xbf16>
    %c0_13 = arith.constant 0 : index
    %c0_14 = arith.constant 0 : index
    %32 = vector.load %arg2[%c0_13, %c0_14] : memref<128x128xbf16, #tpu.memory_space<vmem>>, vector<128x128xbf16>
    %cst_15 = arith.constant dense<0.000000e+00> : vector<8x128xf32>
    %33 = tpu.matmul %31, %32, %cst_15 {dimension_numbers = #tpu.dot_dimension_numbers<[1], [0], [0], [1], [0, 0, 1, 1], [], []>} : vector<8x128xbf16>, vector<128x128xbf16>, vector<8x128xf32> -> vector<8x128xf32>
    %c2 = arith.constant 2 : index
    %c0_16 = arith.constant 0 : index
    %34 = vector.load %arg5[%c2, %c0_16] : memref<8x128xf32, #tpu.memory_space<vmem>>, vector<1x128xf32>
    %c3 = arith.constant 3 : index
    %c0_17 = arith.constant 0 : index
    %35 = vector.load %arg5[%c3, %c0_17] : memref<8x128xf32, #tpu.memory_space<vmem>>, vector<1x128xf32>
    %cst_18 = arith.constant dense<0.000000e+00> : vector<128xf32>
    %36 = vector.multi_reduction <add>, %33, %cst_18 [0] : vector<8x128xf32> to vector<128xf32>
    %37 = vector.shape_cast %36 : vector<128xf32> to vector<1x128xf32>
    %cst_19 = arith.constant 1.250000e-01 : f32
    %38 = vector.broadcast %cst_19 : f32 to vector<1x128xf32>
    %39 = arith.mulf %37, %38 : vector<1x128xf32>
    %40 = arith.mulf %33, %33 : vector<8x128xf32>
    %cst_20 = arith.constant dense<0.000000e+00> : vector<128xf32>
    %41 = vector.multi_reduction <add>, %40, %cst_20 [0] : vector<8x128xf32> to vector<128xf32>
    %42 = vector.shape_cast %41 : vector<128xf32> to vector<1x128xf32>
    %cst_21 = arith.constant 1.250000e-01 : f32
    %43 = vector.broadcast %cst_21 : f32 to vector<1x128xf32>
    %44 = arith.mulf %42, %43 : vector<1x128xf32>
    %45 = arith.mulf %39, %39 : vector<1x128xf32>
    %46 = arith.subf %44, %45 : vector<1x128xf32>
    %cst_22 = arith.constant 0.000000e+00 : f32
    %47 = vector.broadcast %cst_22 : f32 to vector<1x128xf32>
    %48 = arith.maximumf %46, %47 : vector<1x128xf32>
    %cst_23 = arith.constant 9.99999974E-6 : f32
    %49 = vector.broadcast %cst_23 : f32 to vector<1x128xf32>
    %50 = arith.addf %48, %49 : vector<1x128xf32>
    %51 = math.rsqrt %50 : vector<1x128xf32>
    %52 = arith.mulf %34, %51 : vector<1x128xf32>
    %53 = arith.mulf %39, %52 : vector<1x128xf32>
    %54 = arith.subf %35, %53 : vector<1x128xf32>
    %55 = vector.broadcast %52 : vector<1x128xf32> to vector<8x128xf32>
    %56 = arith.mulf %33, %55 : vector<8x128xf32>
    %57 = vector.broadcast %54 : vector<1x128xf32> to vector<8x128xf32>
    %58 = arith.addf %56, %57 : vector<8x128xf32>
    %cst_24 = arith.constant 0.000000e+00 : f32
    %59 = vector.broadcast %cst_24 : f32 to vector<8x128xf32>
    %60 = arith.maximumf %58, %59 : vector<8x128xf32>
    %61 = arith.truncf %60 : vector<8x128xf32> to vector<8x128xbf16>
    %c0_25 = arith.constant 0 : index
    %c0_26 = arith.constant 0 : index
    %62 = vector.load %arg3[%c0_25, %c0_26] : memref<128x128xbf16, #tpu.memory_space<vmem>>, vector<128x128xbf16>
    %cst_27 = arith.constant dense<0.000000e+00> : vector<8x128xf32>
    %63 = tpu.matmul %61, %62, %cst_27 {dimension_numbers = #tpu.dot_dimension_numbers<[1], [0], [0], [1], [0, 0, 1, 1], [], []>} : vector<8x128xbf16>, vector<128x128xbf16>, vector<8x128xf32> -> vector<8x128xf32>
    %c4 = arith.constant 4 : index
    %c0_28 = arith.constant 0 : index
    %64 = vector.load %arg5[%c4, %c0_28] : memref<8x128xf32, #tpu.memory_space<vmem>>, vector<1x128xf32>
    %c5 = arith.constant 5 : index
    %c0_29 = arith.constant 0 : index
    %65 = vector.load %arg5[%c5, %c0_29] : memref<8x128xf32, #tpu.memory_space<vmem>>, vector<1x128xf32>
    %cst_30 = arith.constant dense<0.000000e+00> : vector<128xf32>
    %66 = vector.multi_reduction <add>, %63, %cst_30 [0] : vector<8x128xf32> to vector<128xf32>
    %67 = vector.shape_cast %66 : vector<128xf32> to vector<1x128xf32>
    %cst_31 = arith.constant 1.250000e-01 : f32
    %68 = vector.broadcast %cst_31 : f32 to vector<1x128xf32>
    %69 = arith.mulf %67, %68 : vector<1x128xf32>
    %70 = arith.mulf %63, %63 : vector<8x128xf32>
    %cst_32 = arith.constant dense<0.000000e+00> : vector<128xf32>
    %71 = vector.multi_reduction <add>, %70, %cst_32 [0] : vector<8x128xf32> to vector<128xf32>
    %72 = vector.shape_cast %71 : vector<128xf32> to vector<1x128xf32>
    %cst_33 = arith.constant 1.250000e-01 : f32
    %73 = vector.broadcast %cst_33 : f32 to vector<1x128xf32>
    %74 = arith.mulf %72, %73 : vector<1x128xf32>
    %75 = arith.mulf %69, %69 : vector<1x128xf32>
    %76 = arith.subf %74, %75 : vector<1x128xf32>
    %cst_34 = arith.constant 0.000000e+00 : f32
    %77 = vector.broadcast %cst_34 : f32 to vector<1x128xf32>
    %78 = arith.maximumf %76, %77 : vector<1x128xf32>
    %cst_35 = arith.constant 9.99999974E-6 : f32
    %79 = vector.broadcast %cst_35 : f32 to vector<1x128xf32>
    %80 = arith.addf %78, %79 : vector<1x128xf32>
    %81 = math.rsqrt %80 : vector<1x128xf32>
    %82 = arith.mulf %64, %81 : vector<1x128xf32>
    %83 = arith.mulf %69, %82 : vector<1x128xf32>
    %84 = arith.subf %65, %83 : vector<1x128xf32>
    %85 = vector.broadcast %82 : vector<1x128xf32> to vector<8x128xf32>
    %86 = arith.mulf %63, %85 : vector<8x128xf32>
    %87 = vector.broadcast %84 : vector<1x128xf32> to vector<8x128xf32>
    %88 = arith.addf %86, %87 : vector<8x128xf32>
    %cst_36 = arith.constant 0.000000e+00 : f32
    %89 = vector.broadcast %cst_36 : f32 to vector<8x128xf32>
    %90 = arith.maximumf %88, %89 : vector<8x128xf32>
    %91 = arith.truncf %90 : vector<8x128xf32> to vector<8x128xbf16>
    %c0_37 = arith.constant 0 : index
    %c0_38 = arith.constant 0 : index
    %92 = vector.load %arg4[%c0_37, %c0_38] : memref<128x128xbf16, #tpu.memory_space<vmem>>, vector<128x128xbf16>
    %cst_39 = arith.constant dense<0.000000e+00> : vector<8x128xf32>
    %93 = tpu.matmul %91, %92, %cst_39 {dimension_numbers = #tpu.dot_dimension_numbers<[1], [0], [0], [1], [0, 0, 1, 1], [], []>} : vector<8x128xbf16>, vector<128x128xbf16>, vector<8x128xf32> -> vector<8x128xf32>
    %c6 = arith.constant 6 : index
    %c0_40 = arith.constant 0 : index
    %94 = vector.load %arg5[%c6, %c0_40] : memref<8x128xf32, #tpu.memory_space<vmem>>, vector<1x128xf32>
    %95 = vector.broadcast %94 : vector<1x128xf32> to vector<8x128xf32>
    %96 = arith.addf %93, %95 : vector<8x128xf32>
    %c0_41 = arith.constant 0 : index
    %c0_42 = arith.constant 0 : index
    %97 = vector.load %arg6[%c0_41, %c0_42] : memref<8x128xf32, #tpu.memory_space<vmem>>, vector<8x128xf32>
    tpu.vector_store %arg6[%c0_41, %c0_42], %96 {strides = array<i32>} : memref<8x128xf32, #tpu.memory_space<vmem>>, vector<8x128xf32>,
    return
  }
}

</mosaic_0001>

<bundles_post_ra>
// kernel: simple_dense_net_forward.1
= control target key start
LH: loop header
LB: loop body
LE: loop exit
PB: predicated region body
PF: predicated region fallthrough
CT: control target
= control target key end

     0   :  { %11 = vsyncpa [#allocation3], 0  ;;  %s1921_s0 = inlined_call_operand.vmem [shape: f32[8,1024], index: 0, kind: input, shape index: {}]   ;;  %s1922_s1 = inlined_call_operand.vmem [shape: bf16[1024,128], index: 1, kind: input, shape index: {}]   ;;  %s1923_s2 = inlined_call_operand.vmem [shape: bf16[128,128], index: 2, kind: input, shape index: {}]   ;;  %s1924_s3 = inlined_call_operand.hbm [shape: bf16[128,128], index: 3, kind: input, shape index: {}]   ;;  %s1925_s4 = inlined_call_operand.hbm [shape: bf16[128,128], index: 4, kind: input, shape index: {}]   ;;  %s1926_s5 = inlined_call_operand.hbm [shape: f32[8,128], index: 5, kind: input, shape index: {}]   ;;  %s1927_s6 = inlined_call_operand.hbm [shape: f32[8,128], index: 6, kind: output, shape index: {}]  }
   0x1   :  { %12 = vsyncpa [#allocation6], 0 }
   0x2   :  { %13 = vsyncpa [#allocation4], 0  ;;  %s37_s23 = sshll.u32 %s1925_s4, 4  ;;  %s1628_s24 = smov [#allocation5]   ;;  %s38_s23 = int_to_ptr.hbm [resolvable:$true] %s37_s23 }
   0x3   :  { %s39_s25 = sshll.u32 %s1628_s24, 4  ;;  %s24_s28 = sshll.u32 %s1924_s3, 4  ;;  %s40_s25 = int_to_ptr.vmem [resolvable:$true] %s39_s25  ;;  %s25_s28 = int_to_ptr.hbm [resolvable:$true] %s24_s28 }
   0x4   :  { %s1629_s29 = smov 64   ;;  %s1630_s30 = smov 4  }
   0x5   :  { %45 = dma.hbm_to_vmem [thread:$0]  %s38_s23, 1024, %s40_s25, [#allocation6], %s1629_s29, %s1629_s29, %s1630_s30  }
   0x6   :  { %s1631_s7 = smov [#allocation2]   ;;  %s51_s11 = sshll.u32 %s1926_s5, 4  ;;  %s52_s11 = int_to_ptr.hbm [resolvable:$true] %s51_s11 }
   0x7   :  { %s26_s8 = sshll.u32 %s1631_s7, 4  ;;  %s1632_s4 = smov [#allocation7]   ;;  %s27_s8 = int_to_ptr.vmem [resolvable:$true] %s26_s8 }
   0x8   :  { %32 = dma.hbm_to_vmem [thread:$0]  %s25_s28, 1024, %s27_s8, [#allocation3], %s1629_s29, %s1629_s29, %s1630_s30  }
   0x9   :  { %s53_s12 = sshll.u32 %s1632_s4, 4  ;;  %s54_s12 = int_to_ptr.vmem [resolvable:$true] %s53_s12 }
   0xa   :  { %56 = dma.hbm_to_vmem [thread:$0]  %s52_s11, 128, %s54_s12, [#allocation6]  }
   0xb   :  { %1622 = dma.done.wait [#allocation3], 1024  }
   0xc   :  { %1623 = vsyncadd [#allocation3], 4294966272 }
   0xd   :  { %1624 = dma.done.wait [#allocation6], 1152  }
   0xe   :  { %1625 = vsyncadd [#allocation6], 4294966144  ;;  %v1432_v0 = vld [vmem:[%s1922_s1 + $0x38] sm:$0xff]  ;;  %v1431_v4 = vld [vmem:[%s1922_s1 + $0x30] sm:$0xff]  ;;  %s1062_s12 = sshll.u32 %s1927_s6, 4  ;;  %s1063_s12 = int_to_ptr.hbm [resolvable:$true] %s1062_s12 }
   0xf   :  { %v1440_v1 = vld [vmem:[%s1922_s1 + $0x78] sm:$0xff]  ;;  %597 = vmatpush.bf16.msra.mxu0 %v1432_v0  ;;  %v1439_v5 = vld [vmem:[%s1922_s1 + $0x70] sm:$0xff]  ;;  %v1430_v8 = vld [vmem:[%s1922_s1 + $0x28] sm:$0xff] }
  0x10   :  { %v1448_v2 = vld [vmem:[%s1922_s1 + $0xb8] sm:$0xff]  ;;  %610 = vmatpush.bf16.msra.mxu1 %v1440_v1  ;;  %v1447_v6 = vld [vmem:[%s1922_s1 + $0xb0] sm:$0xff]  ;;  %v1438_v9 = vld [vmem:[%s1922_s1 + $0x68] sm:$0xff] }
  0x11   :  { %v1456_v3 = vld [vmem:[%s1922_s1 + $0xf8] sm:$0xff]  ;;  %623 = vmatpush.bf16.msra.mxu2 %v1448_v2  ;;  %v1455_v7 = vld [vmem:[%s1922_s1 + $0xf0] sm:$0xff]  ;;  %v1446_v10 = vld [vmem:[%s1922_s1 + $0xa8] sm:$0xff] }
  0x12   :  { %636 = vmatpush.bf16.msra.mxu3 %v1456_v3  ;;  %v1454_v11 = vld [vmem:[%s1922_s1 + $0xe8] sm:$0xff]  ;;  %v1429_v12 = vld [vmem:[%s1922_s1 + $0x20] sm:$0xff]  ;;  %v1428_v16 = vld [vmem:[%s1922_s1 + $0x18] sm:$0xff] }
  0x13   :  { %598 = vmatpush.bf16.msra.mxu0 %v1431_v4  ;;  %v1437_v13 = vld [vmem:[%s1922_s1 + $0x60] sm:$0xff]  ;;  %v1436_v17 = vld [vmem:[%s1922_s1 + $0x58] sm:$0xff]  ;;  %v1427_v20 = vld [vmem:[%s1922_s1 + $0x10] sm:$0xff] }
  0x14   :  { %611 = vmatpush.bf16.msra.mxu1 %v1439_v5  ;;  %v1445_v14 = vld [vmem:[%s1922_s1 + $0xa0] sm:$0xff]  ;;  %v1444_v18 = vld [vmem:[%s1922_s1 + $0x98] sm:$0xff]  ;;  %v1435_v21 = vld [vmem:[%s1922_s1 + $0x50] sm:$0xff] }
  0x15   :  { %624 = vmatpush.bf16.msra.mxu2 %v1447_v6  ;;  %v1453_v15 = vld [vmem:[%s1922_s1 + $0xe0] sm:$0xff]  ;;  %v1452_v19 = vld [vmem:[%s1922_s1 + $0xd8] sm:$0xff]  ;;  %v1443_v22 = vld [vmem:[%s1922_s1 + $0x90] sm:$0xff] }
  0x16   :  { %637 = vmatpush.bf16.msra.mxu3 %v1455_v7  ;;  %v1451_v23 = vld [vmem:[%s1922_s1 + $0xd0] sm:$0xff]  ;;  %v1426_v24 = vld [vmem:[%s1922_s1 + $0x8] sm:$0xff]  ;;  %v1425_v28 = vld [vmem:[%s1922_s1] sm:$0xff] }
  0x17   :  { %599 = vmatpush.bf16.msra.mxu0 %v1430_v8  ;;  %v1434_v25 = vld [vmem:[%s1922_s1 + $0x48] sm:$0xff]  ;;  %v1433_v29 = vld [vmem:[%s1922_s1 + $0x40] sm:$0xff]  ;;  %v1464_v32 = vld [vmem:[%s1922_s1 + $0x138] sm:$0xff] }
  0x18   :  { %612 = vmatpush.bf16.msra.mxu1 %v1438_v9  ;;  %v1442_v26 = vld [vmem:[%s1922_s1 + $0x88] sm:$0xff]  ;;  %v1441_v30 = vld [vmem:[%s1922_s1 + $0x80] sm:$0xff]  ;;  %v71_v33 = vld [vmem:[%s1921_s0 + $0x10] sm:$0xff] }
  0x19   :  { %625 = vmatpush.bf16.msra.mxu2 %v1446_v10  ;;  %v1450_v27 = vld [vmem:[%s1922_s1 + $0xc8] sm:$0xff]  ;;  %v1449_v31 = vld [vmem:[%s1922_s1 + $0xc0] sm:$0xff]  ;;  %v1472_v35 = vld [vmem:[%s1922_s1 + $0x178] sm:$0xff]  ;;  %v79_v40 = vpack.c.bf16 %v71_v33, %v71_v33 }
  0x1a   :  { %638 = vmatpush.bf16.msra.mxu3 %v1454_v11  ;;  %v69_v34 = vld [vmem:[%s1921_s0] sm:$0xff]  ;;  %v72_v36 = vld [vmem:[%s1921_s0 + $0x18] sm:$0xff]  ;;  %v70_v37 = vld [vmem:[%s1921_s0 + $0x8] sm:$0xff] }
  0x1b   :  { %600 = vmatpush.bf16.msra.mxu0 %v1429_v12  ;;  %v1480_v38 = vld [vmem:[%s1922_s1 + $0x1b8] sm:$0xff]  ;;  %v77_v41 = vpack.c.bf16 %v69_v34, %v69_v34  ;;  %v80_v42 = vpack.c.bf16 %v72_v36, %v72_v36  ;;  %v78_v43 = vpack.c.bf16 %v70_v37, %v70_v37  ;;  %v1463_v44 = vld [vmem:[%s1922_s1 + $0x130] sm:$0xff]  ;;  %v1462_v48 = vld [vmem:[%s1922_s1 + $0x128] sm:$0xff] }
  0x1c   :  { %613 = vmatpush.bf16.msra.mxu1 %v1437_v13  ;;  %v1488_v39 = vld [vmem:[%s1922_s1 + $0x1f8] sm:$0xff]  ;;  %v1471_v45 = vld [vmem:[%s1922_s1 + $0x170] sm:$0xff]  ;;  %v1470_v49 = vld [vmem:[%s1922_s1 + $0x168] sm:$0xff] }
  0x1d   :  { %626 = vmatpush.bf16.msra.mxu2 %v1445_v14  ;;  %v1479_v46 = vld [vmem:[%s1922_s1 + $0x1b0] sm:$0xff]  ;;  %v1478_v50 = vld [vmem:[%s1922_s1 + $0x1a8] sm:$0xff]  ;;  %v1461_v52 = vld [vmem:[%s1922_s1 + $0x120] sm:$0xff] }
  0x1e   :  { %639 = vmatpush.bf16.msra.mxu3 %v1453_v15  ;;  %v1487_v47 = vld [vmem:[%s1922_s1 + $0x1f0] sm:$0xff]  ;;  %v1486_v51 = vld [vmem:[%s1922_s1 + $0x1e8] sm:$0xff]  ;;  %v1469_v53 = vld [vmem:[%s1922_s1 + $0x160] sm:$0xff] }
  0x1f   :  { %601 = vmatpush.bf16.msra.mxu0 %v1428_v16  ;;  %v1477_v54 = vld [vmem:[%s1922_s1 + $0x1a0] sm:$0xff]  ;;  %v1460_v56 = vld [vmem:[%s1922_s1 + $0x118] sm:$0xff]  ;;  %v1459_v60 = vld [vmem:[%s1922_s1 + $0x110] sm:$0xff] }
  0x20   :  { %614 = vmatpush.bf16.msra.mxu1 %v1436_v17  ;;  %v1485_v55 = vld [vmem:[%s1922_s1 + $0x1e0] sm:$0xff]  ;;  %v1468_v57 = vld [vmem:[%s1922_s1 + $0x158] sm:$0xff]  ;;  %v1467_v61 = vld [vmem:[%s1922_s1 + $0x150] sm:$0xff] }
  0x21   :  { %627 = vmatpush.bf16.msra.mxu2 %v1444_v18  ;;  %v1476_v58 = vld [vmem:[%s1922_s1 + $0x198] sm:$0xff]  ;;  %v1475_v62 = vld [vmem:[%s1922_s1 + $0x190] sm:$0xff]  ;;  %v1458_v0 = vld [vmem:[%s1922_s1 + $0x108] sm:$0xff] }
  0x22   :  { %640 = vmatpush.bf16.msra.mxu3 %v1452_v19  ;;  %v1484_v59 = vld [vmem:[%s1922_s1 + $0x1d8] sm:$0xff]  ;;  %v1483_v63 = vld [vmem:[%s1922_s1 + $0x1d0] sm:$0xff]  ;;  %v1466_v1 = vld [vmem:[%s1922_s1 + $0x148] sm:$0xff] }
  0x23   :  { %602 = vmatpush.bf16.msra.mxu0 %v1427_v20  ;;  %v1474_v2 = vld [vmem:[%s1922_s1 + $0x188] sm:$0xff]  ;;  %v1457_v4 = vld [vmem:[%s1922_s1 + $0x100] sm:$0xff]  ;;  %v75_v10 = vld [vmem:[%s1921_s0 + $0x30] sm:$0xff] }
  0x24   :  { %615 = vmatpush.bf16.msra.mxu1 %v1435_v21  ;;  %v1482_v3 = vld [vmem:[%s1922_s1 + $0x1c8] sm:$0xff]  ;;  %v1465_v5 = vld [vmem:[%s1922_s1 + $0x140] sm:$0xff]  ;;  %v76_v11 = vld [vmem:[%s1921_s0 + $0x38] sm:$0xff]  ;;  %v83_v14 = vpack.c.bf16 %v75_v10, %v75_v10 }
  0x25   :  { %628 = vmatpush.bf16.msra.mxu2 %v1443_v22  ;;  %v1473_v6 = vld [vmem:[%s1922_s1 + $0x180] sm:$0xff]  ;;  %v74_v8 = vld [vmem:[%s1921_s0 + $0x28] sm:$0xff]  ;;  %v84_v15 = vpack.c.bf16 %v76_v11, %v76_v11 }
  0x26   :  { %641 = vmatpush.bf16.msra.mxu3 %v1451_v23  ;;  %v73_v7 = vld [vmem:[%s1921_s0 + $0x20] sm:$0xff]  ;;  %v82_v13 = vpack.c.bf16 %v74_v8, %v74_v8 }
  0x27   :  { %603 = vmatpush.bf16.msra.mxu0 %v1426_v24  ;;  %v1481_v9 = vld [vmem:[%s1922_s1 + $0x1c0] sm:$0xff]  ;;  %v81_v12 = vpack.c.bf16 %v73_v7, %v73_v7 }
  0x28   :  { %616 = vmatpush.bf16.msra.mxu1 %v1434_v25  ;;  %v701_v7 = vld [vmem:[#allocation7] sm:$0x1]  ;;  %v702_v11 = vld [vmem:[#allocation7 + $0x1] sm:$0x1] }
  0x29   :  { %629 = vmatpush.bf16.msra.mxu2 %v1442_v26 }
  0x2a   :  { %642 = vmatpush.bf16.msra.mxu3 %v1450_v27 }
  0x2b   :  { %604 = vmatpush.bf16.msra.mxu0 %v1425_v28 }
  0x2c   :  { %617 = vmatpush.bf16.msra.mxu1 %v1433_v29  ;;  %v1496_v29 = vld [vmem:[%s1923_s2 + $0x38] sm:$0xff] }
  0x2d   :  { %630 = vmatpush.bf16.msra.mxu2 %v1441_v30 }
  0x2e   :  { %643 = vmatpush.bf16.msra.mxu3 %v1449_v31  ;;  %605 = vmatmul.bf16.vlgmr.msra.gmra.mxu0 %v77_v41  ;;  %v1495_v31 = vld [vmem:[%s1923_s2 + $0x30] sm:$0xff] }
  0x2f   :  { %649 = vmatpush.bf16.msrb.mxu0 %v1464_v32  ;;  %618 = vmatmul.bf16.vlgmr.msra.gmra.mxu1 %v78_v43 }
  0x30   :  { %662 = vmatpush.bf16.msrb.mxu1 %v1472_v35  ;;  %631 = vmatmul.bf16.vlgmr.msra.gmra.mxu2 %v79_v40 }
  0x31   :  { %675 = vmatpush.bf16.msrb.mxu2 %v1480_v38  ;;  %644 = vmatmul.bf16.vlgmr.msra.gmra.mxu3 %v80_v42  ;;  %v1494_v38 = vld [vmem:[%s1923_s2 + $0x28] sm:$0xff]  ;;  %v1493_v42 = vld [vmem:[%s1923_s2 + $0x20] sm:$0xff] }
  0x32   :  { %688 = vmatpush.bf16.msrb.mxu3 %v1488_v39 }
  0x33   :  { %650 = vmatpush.bf16.msrb.mxu0 %v1463_v44 }
  0x34   :  { %663 = vmatpush.bf16.msrb.mxu1 %v1471_v45 }
  0x35   :  { %676 = vmatpush.bf16.msrb.mxu2 %v1479_v46 }
  0x36   :  { %689 = vmatpush.bf16.msrb.mxu3 %v1487_v47 }
  0x37   :  { %651 = vmatpush.bf16.msrb.mxu0 %v1462_v48 }
  0x38   :  { %664 = vmatpush.bf16.msrb.mxu1 %v1470_v49  ;;  %v1492_v49 = vld [vmem:[%s1923_s2 + $0x18] sm:$0xff] }
  0x39   :  { %677 = vmatpush.bf16.msrb.mxu2 %v1478_v50 }
  0x3a   :  { %690 = vmatpush.bf16.msrb.mxu3 %v1486_v51 }
  0x3b   :  { %652 = vmatpush.bf16.msrb.mxu0 %v1461_v52 }
  0x3c   :  { %665 = vmatpush.bf16.msrb.mxu1 %v1469_v53 }
  0x3d   :  { %678 = vmatpush.bf16.msrb.mxu2 %v1477_v54  ;;  %v1491_v54 = vld [vmem:[%s1923_s2 + $0x10] sm:$0xff] }
  0x3e   :  { %691 = vmatpush.bf16.msrb.mxu3 %v1485_v55 }
  0x3f   :  { %653 = vmatpush.bf16.msrb.mxu0 %v1460_v56 }
  0x40   :  { %666 = vmatpush.bf16.msrb.mxu1 %v1468_v57 }
  0x41   :  { %679 = vmatpush.bf16.msrb.mxu2 %v1476_v58 }
  0x42   :  { %692 = vmatpush.bf16.msrb.mxu3 %v1484_v59  ;;  %v1490_v59 = vld [vmem:[%s1923_s2 + $0x8] sm:$0xff] }
  0x43   :  { %654 = vmatpush.bf16.msrb.mxu0 %v1459_v60 }
  0x44   :  { %667 = vmatpush.bf16.msrb.mxu1 %v1467_v61 }
  0x45   :  { %680 = vmatpush.bf16.msrb.mxu2 %v1475_v62  ;;  %v1489_v62 = vld [vmem:[%s1923_s2] sm:$0xff]  ;;  %s1633_s2 = smov [#allocation8]  }
  0x46   :  { %693 = vmatpush.bf16.msrb.mxu3 %v1483_v63  ;;  %s1060_s10 = sshll.u32 %s1633_s2, 4  ;;  %s1061_s10 = int_to_ptr.vmem [resolvable:$true] %s1060_s10 }
  0x47   :  { %655 = vmatpush.bf16.msrb.mxu0 %v1458_v0 }
  0x48   :  { %668 = vmatpush.bf16.msrb.mxu1 %v1466_v1 }
  0x49   :  { %681 = vmatpush.bf16.msrb.mxu2 %v1474_v2 }
  0x4a   :  { %694 = vmatpush.bf16.msrb.mxu3 %v1482_v3 }
  0x4b   :  { %656 = vmatpush.bf16.msrb.mxu0 %v1457_v4 }
  0x4c   :  { %669 = vmatpush.bf16.msrb.mxu1 %v1465_v5 }
  0x4d   :  { %682 = vmatpush.bf16.msrb.mxu2 %v1473_v6 }
  0x4e   :  { %695 = vmatpush.bf16.msrb.mxu3 %v1481_v9  ;;  %657 = vmatmul.bf16.vlgmr.msrb.gmra.mxu0 %v81_v12 }
  0x4f   :  { %670 = vmatmul.bf16.vlgmr.msrb.gmra.mxu1 %v82_v13  ;;  %805 = vmatpush.bf16.msra.mxu0 %v1496_v29 }
  0x50   :  { %683 = vmatmul.bf16.vlgmr.msrb.gmra.mxu2 %v83_v14 }
  0x51   :  { %696 = vmatmul.bf16.vlgmr.msrb.gmra.mxu3 %v84_v15 }
  0x53   :  { %806 = vmatpush.bf16.msra.mxu0 %v1495_v31  ;;  %v1500_v31 = vld [vmem:[#allocation2 + $0x18] sm:$0xff] }
  0x57   :  { %807 = vmatpush.bf16.msra.mxu0 %v1494_v38 }
  0x5b   :  { %808 = vmatpush.bf16.msra.mxu0 %v1493_v42  ;;  %v1498_v42 = vld [vmem:[#allocation2 + $0x8] sm:$0xff] }
  0x5f   :  { %809 = vmatpush.bf16.msra.mxu0 %v1492_v49 }
  0x63   :  { %810 = vmatpush.bf16.msra.mxu0 %v1491_v54  ;;  %v818_v54 = vld [vmem:[#allocation7 + $0x2] sm:$0x1] }
  0x67   :  { %811 = vmatpush.bf16.msra.mxu0 %v1490_v59 }
  0x6b   :  { %812 = vmatpush.bf16.msra.mxu0 %v1489_v62 }
  0xab   :  { %v606_v16 = vpop.f32.mrf.mxu0 }
  0xac   :  { %v619_v17 = vpop.f32.mrf.mxu1 }
  0xad   :  { %v620_v24 = vadd.f32 %v619_v17, %v606_v16 }
  0xb3   :  { %v632_v18 = vpop.f32.mrf.mxu2  ;;  %v608_v20 = vpop.f32.mrf.mxu0 }
  0xb4   :  { %v645_v19 = vpop.f32.mrf.mxu3  ;;  %v621_v21 = vpop.f32.mrf.mxu1  ;;  %v633_v25 = vadd.f32 %v632_v18, %v620_v24  ;;  %v1504_v20 = vld [vmem:[#allocation2 + $0x38] sm:$0xff] }
  0xb5   :  { %922 = vmatpush.bf16.msra.mxu1 %v1504_v20  ;;  %v1503_v21 = vld [vmem:[#allocation2 + $0x30] sm:$0xff] }
  0xb6   :  { %v646_v26 = vadd.f32 %v645_v19, %v633_v25  ;;  %v1507_v20 = vld [vmem:[#allocation5 + $0x10] sm:$0xff] }
  0xb9   :  { %923 = vmatpush.bf16.msra.mxu1 %v1503_v21 }
  0xbb   :  { %v634_v22 = vpop.f32.mrf.mxu2 }
  0xbc   :  { %v647_v23 = vpop.f32.mrf.mxu3  ;;  %v1502_v22 = vld [vmem:[#allocation2 + $0x28] sm:$0xff] }
  0xbd   :  { %924 = vmatpush.bf16.msra.mxu1 %v1502_v22 }
  0xcb   :  { %v658_v27 = vpop.f32.mrf.mxu0 }
  0xcc   :  { %v671_v28 = vpop.f32.mrf.mxu1  ;;  %v659_v30 = vadd.f32 %v658_v27, %v646_v26  ;;  %v1501_v26 = vld [vmem:[#allocation2 + $0x20] sm:$0xff] }
  0xcd   :  { %925 = vmatpush.bf16.msra.mxu1 %v1501_v26 }
  0xce   :  { %v672_v32 = vadd.f32 %v671_v28, %v659_v30 }
  0xd1   :  { %926 = vmatpush.bf16.msra.mxu1 %v1500_v31 }
  0xd3   :  { %v684_v33 = vpop.f32.mrf.mxu2  ;;  %v660_v36 = vpop.f32.mrf.mxu0 }
  0xd4   :  { %v697_v34 = vpop.f32.mrf.mxu3  ;;  %v685_v35 = vadd.f32 %v684_v33, %v672_v32  ;;  %v673_v37 = vpop.f32.mrf.mxu1 }
  0xd5   :  { %v1499_v37 = vld [vmem:[#allocation2 + $0x10] sm:$0xff] }
  0xd6   :  { %v698_v39 = vadd.f32 %v697_v34, %v685_v35  ;;  %927 = vmatpush.bf16.msra.mxu1 %v1499_v37  ;;  %v935_v37 = vld [vmem:[#allocation7 + $0x4] sm:$0x1] }
  0xd8   :  { %v703_v40 = vrot.slane %v698_v39, 4  ;;  %v710_v41 = vmul.f32 %v698_v39, %v698_v39 }
  0xda   :  { %v704_v43 = vadd.f32 %v703_v40, %v698_v39  ;;  %v711_v44 = vrot.slane %v710_v41, 4  ;;  %928 = vmatpush.bf16.msra.mxu1 %v1498_v42 }
  0xdb   :  { %v686_v45 = vpop.f32.mrf.mxu2 }
  0xdc   :  { %v699_v46 = vpop.f32.mrf.mxu3  ;;  %v705_v47 = vrot.slane %v704_v43, 2  ;;  %v712_v48 = vadd.f32 %v711_v44, %v710_v41 }
  0xdd   :  { %v1497_v46 = vld [vmem:[#allocation2] sm:$0xff] }
  0xde   :  { %v706_v50 = vadd.f32 %v705_v47, %v704_v43  ;;  %v713_v51 = vrot.slane %v712_v48, 2  ;;  %929 = vmatpush.bf16.msra.mxu1 %v1497_v46 }
  0xe0   :  { %v707_v52 = vrot.slane %v706_v50, 1  ;;  %v714_v53 = vadd.f32 %v713_v51, %v712_v48 }
  0xe2   :  { %v708_v55 = vadd.f32 %v707_v52, %v706_v50  ;;  %v715_v56 = vrot.slane %v714_v53, 1 }
  0xe4   :  { %v709_v57 = vmul.f32 0.125, %v708_v55  ;;  %v716_v58 = vadd.f32 %v715_v56, %v714_v53 }
  0xe6   :  { %v717_v60 = vmul.f32 0.125, %v716_v58  ;;  %v718_v61 = vmul.f32 %v709_v57, %v709_v57  ;;  %v819_v58 = vld [vmem:[#allocation7 + $0x3] sm:$0x1] }
  0xe8   :  { %v719_v63 = vsub.f32 %v717_v60, %v718_v61 }
  0xea   :  { %v720_v0 = vmax.f32 %v719_v63, 0.0 }
  0xec   :  { %v721_v1 = vadd.f32 1e-05, %v720_v0 }
  0xee   :  { %1520 = vrsqrt.f32 %v721_v1  ;;  %vm728_vm1 = vweird.f32 %v721_v1 }
  0xf4   :  { %v1521_v2 = vpop.eup %1520 }
  0xf5   :  { %v723_v3 = vmul.f32 %v1521_v2, %v721_v1  ;;  %vm729_vm0 = vweird.f32 %v1521_v2 }
  0xf6   :  { %vm730_vm2 = vmor %vm728_vm1, %vm729_vm0 }
  0xf7   :  { %v724_v4 = vmul.f32 %v1521_v2, %v723_v3  ;;  %v1512_v3 = vld [vmem:[#allocation5 + $0x38] sm:$0xff] }
  0xf8   :  { %1041 = vmatpush.bf16.msra.mxu2 %v1512_v3 }
  0xf9   :  { %v725_v5 = vmul.f32 0.5, %v724_v4  ;;  %v1511_v4 = vld [vmem:[#allocation5 + $0x30] sm:$0xff] }
  0xfb   :  { %v726_v6 = vsub.f32 1.5, %v725_v5  ;;  %v1510_v5 = vld [vmem:[#allocation5 + $0x28] sm:$0xff] }
  0xfc   :  { %1042 = vmatpush.bf16.msra.mxu2 %v1511_v4 }
  0xfd   :  { %v727_v8 = vmul.f32 %v1521_v2, %v726_v6 }
  0xff   :  { %v731_v9 = vsel %vm730_vm2, %v1521_v2, %v727_v8 }
 0x100   :  { %v732_v10 = vmul.f32 %v731_v9, %v701_v7  ;;  %1043 = vmatpush.bf16.msra.mxu2 %v1510_v5  ;;  %v1509_v9 = vld [vmem:[#allocation5 + $0x20] sm:$0xff] }
 0x102   :  { %v735_v12 = vperm.slane %v732_v10, 0  ;;  %v733_v13 = vmul.f32 %v732_v10, %v709_v57 }
 0x104   :  { %v734_v14 = vsub.f32 %v702_v11, %v733_v13  ;;  %v736_v15 = vmul.f32 %v735_v12, %v698_v39  ;;  %1044 = vmatpush.bf16.msra.mxu2 %v1509_v9 }
 0x106   :  { %v737_v16 = vperm.slane %v734_v14, 0  ;;  %v1508_v14 = vld [vmem:[#allocation5 + $0x18] sm:$0xff] }
 0x108   :  { %v738_v17 = vadd.f32 %v737_v16, %v736_v15  ;;  %1045 = vmatpush.bf16.msra.mxu2 %v1508_v14 }
 0x10a   :  { %v739_v18 = vmax.f32 %v738_v17, 0.0 }
 0x10c   :  { %v740_v19 = vpack.c.bf16 %v739_v18, %v739_v18  ;;  %1046 = vmatpush.bf16.msra.mxu2 %v1507_v20 }
 0x10e   :  { %813 = vmatmul.bf16.vlgmr.msra.gmra.mxu0 %v740_v19 }
 0x18b   :  { %v814_v23 = vpop.f32.mrf.mxu0 }
 0x18c   :  { %v820_v24 = vrot.slane %v814_v23, 4  ;;  %v827_v25 = vmul.f32 %v814_v23, %v814_v23 }
 0x18e   :  { %v821_v27 = vadd.f32 %v820_v24, %v814_v23  ;;  %v828_v28 = vrot.slane %v827_v25, 4 }
 0x190   :  { %v822_v29 = vrot.slane %v821_v27, 2  ;;  %v829_v30 = vadd.f32 %v828_v28, %v827_v25  ;;  %v1506_v25 = vld [vmem:[#allocation5 + $0x8] sm:$0xff] }
 0x191   :  { %1047 = vmatpush.bf16.msra.mxu2 %v1506_v25 }
 0x192   :  { %v823_v32 = vadd.f32 %v822_v29, %v821_v27  ;;  %v830_v33 = vrot.slane %v829_v30, 2  ;;  %v1505_v29 = vld [vmem:[#allocation5] sm:$0xff] }
 0x193   :  { %v816_v34 = vpop.f32.mrf.mxu0 }
 0x194   :  { %v824_v35 = vrot.slane %v823_v32, 1  ;;  %v831_v36 = vadd.f32 %v830_v33, %v829_v30 }
 0x195   :  { %1048 = vmatpush.bf16.msra.mxu2 %v1505_v29 }
 0x196   :  { %v825_v38 = vadd.f32 %v824_v35, %v823_v32  ;;  %v832_v39 = vrot.slane %v831_v36, 1 }
 0x198   :  { %v826_v40 = vmul.f32 0.125, %v825_v38  ;;  %v833_v41 = vadd.f32 %v832_v39, %v831_v36 }
 0x19a   :  { %v834_v43 = vmul.f32 0.125, %v833_v41  ;;  %v835_v44 = vmul.f32 %v826_v40, %v826_v40  ;;  %v936_v41 = vld [vmem:[#allocation7 + $0x5] sm:$0x1] }
 0x19c   :  { %v836_v45 = vsub.f32 %v834_v43, %v835_v44 }
 0x19e   :  { %v837_v47 = vmax.f32 %v836_v45, 0.0 }
 0x1a0   :  { %v838_v48 = vadd.f32 1e-05, %v837_v47 }
 0x1a2   :  { %1522 = vrsqrt.f32 %v838_v48  ;;  %vm845_vm4 = vweird.f32 %v838_v48 }
 0x1a8   :  { %v1523_v49 = vpop.eup %1522 }
 0x1a9   :  { %v840_v50 = vmul.f32 %v1523_v49, %v838_v48  ;;  %vm846_vm3 = vweird.f32 %v1523_v49 }
 0x1aa   :  { %vm847_vm5 = vmor %vm845_vm4, %vm846_vm3 }
 0x1ab   :  { %v841_v51 = vmul.f32 %v1523_v49, %v840_v50  ;;  %v1519_v50 = vld [vmem:[#allocation7 + $0x6] ss:$0 sm:$0xff] }
 0x1ad   :  { %v842_v52 = vmul.f32 0.5, %v841_v51 }
 0x1af   :  { %v843_v53 = vsub.f32 1.5, %v842_v52 }
 0x1b1   :  { %v844_v55 = vmul.f32 %v1523_v49, %v843_v53 }
 0x1b3   :  { %v848_v56 = vsel %vm847_vm5, %v1523_v49, %v844_v55 }
 0x1b4   :  { %v849_v57 = vmul.f32 %v848_v56, %v818_v54 }
 0x1b6   :  { %v850_v59 = vmul.f32 %v849_v57, %v826_v40  ;;  %v852_v60 = vperm.slane %v849_v57, 0 }
 0x1b8   :  { %v851_v61 = vsub.f32 %v819_v58, %v850_v59  ;;  %v853_v62 = vmul.f32 %v852_v60, %v814_v23 }
 0x1ba   :  { %v854_v63 = vperm.slane %v851_v61, 0 }
 0x1bc   :  { %v855_v0 = vadd.f32 %v854_v63, %v853_v62 }
 0x1be   :  { %v856_v1 = vmax.f32 %v855_v0, 0.0 }
 0x1c0   :  { %v857_v2 = vpack.c.bf16 %v856_v1, %v856_v1 }
 0x1c2   :  { %930 = vmatmul.bf16.vlgmr.msra.gmra.mxu1 %v857_v2 }
 0x23f   :  { %v931_v6 = vpop.f32.mrf.mxu1 }
 0x240   :  { %v937_v7 = vrot.slane %v931_v6, 4  ;;  %v944_v8 = vmul.f32 %v931_v6, %v931_v6 }
 0x242   :  { %v938_v10 = vadd.f32 %v937_v7, %v931_v6  ;;  %v945_v11 = vrot.slane %v944_v8, 4 }
 0x244   :  { %v939_v12 = vrot.slane %v938_v10, 2  ;;  %v946_v13 = vadd.f32 %v945_v11, %v944_v8 }
 0x246   :  { %v940_v15 = vadd.f32 %v939_v12, %v938_v10  ;;  %v947_v16 = vrot.slane %v946_v13, 2 }
 0x247   :  { %v933_v17 = vpop.f32.mrf.mxu1 }
 0x248   :  { %v941_v18 = vrot.slane %v940_v15, 1  ;;  %v948_v19 = vadd.f32 %v947_v16, %v946_v13 }
 0x24a   :  { %v942_v21 = vadd.f32 %v941_v18, %v940_v15  ;;  %v949_v22 = vrot.slane %v948_v19, 1 }
 0x24c   :  { %v943_v23 = vmul.f32 0.125, %v942_v21  ;;  %v950_v24 = vadd.f32 %v949_v22, %v948_v19 }
 0x24e   :  { %v951_v26 = vmul.f32 0.125, %v950_v24  ;;  %v952_v27 = vmul.f32 %v943_v23, %v943_v23 }
 0x250   :  { %v953_v28 = vsub.f32 %v951_v26, %v952_v27 }
 0x252   :  { %v954_v30 = vmax.f32 %v953_v28, 0.0 }
 0x254   :  { %v955_v31 = vadd.f32 1e-05, %v954_v30 }
 0x256   :  { %1524 = vrsqrt.f32 %v955_v31  ;;  %vm962_vm7 = vweird.f32 %v955_v31 }
 0x25c   :  { %v1525_v32 = vpop.eup %1524 }
 0x25d   :  { %v957_v33 = vmul.f32 %v1525_v32, %v955_v31  ;;  %vm963_vm6 = vweird.f32 %v1525_v32 }
 0x25e   :  { %vm964_vm8 = vmor %vm962_vm7, %vm963_vm6 }
 0x25f   :  { %v958_v34 = vmul.f32 %v1525_v32, %v957_v33 }
 0x261   :  { %v959_v35 = vmul.f32 0.5, %v958_v34 }
 0x263   :  { %v960_v36 = vsub.f32 1.5, %v959_v35 }
 0x265   :  { %v961_v38 = vmul.f32 %v1525_v32, %v960_v36 }
 0x267   :  { %v965_v39 = vsel %vm964_vm8, %v1525_v32, %v961_v38 }
 0x268   :  { %v966_v40 = vmul.f32 %v965_v39, %v935_v37 }
 0x26a   :  { %v967_v42 = vmul.f32 %v966_v40, %v943_v23  ;;  %v969_v43 = vperm.slane %v966_v40, 0 }
 0x26c   :  { %v968_v44 = vsub.f32 %v936_v41, %v967_v42  ;;  %v970_v45 = vmul.f32 %v969_v43, %v931_v6 }
 0x26e   :  { %v971_v46 = vperm.slane %v968_v44, 0 }
 0x270   :  { %v972_v47 = vadd.f32 %v971_v46, %v970_v45 }
 0x272   :  { %v973_v48 = vmax.f32 %v972_v47, 0.0 }
 0x274   :  { %v974_v49 = vpack.c.bf16 %v973_v48, %v973_v48 }
 0x276   :  { %1049 = vmatmul.bf16.vlgmr.msra.gmra.mxu2 %v974_v49 }
 0x2f9   :  { %v1050_v51 = vpop.f32.mrf.mxu2 }
 0x2fa   :  { %v1051_v52 = vadd.f32 %v1519_v50, %v1050_v51 }
 0x2fc   :  { %1054 = vst [vmem:[#allocation8] sm:$0xff] %v1051_v52 }
 0x2fd   :  { %1065 = dma.vmem_to_hbm [thread:$0]  %s1061_s10, 128, %s1063_s12, [#allocation4]  }
 0x301   :  { %v1052_v53 = vpop.f32.mrf.mxu2 }
 0x302   :  { %1626 = dma.done.wait [#allocation4], 128  }
 0x303   :  { %1627 = vsyncadd [#allocation4], 4294967168 }
 0x304   :  { %1070 = vsyncpa [#allocation3], 1 }
 0x305   :  { %1071 = vsyncpa [#allocation6], 1 }
 0x306   :  { %1072 = vsyncpa [#allocation4], 1 }

</bundles_post_ra>
